<compile_context>
chip_gen: v7x
topology: tpu7x:2x2x1
jax: 0.10.0
libtpu: 0.0.40
codegen_flags: <defaults>
</compile_context>

<pallas_src>
import functools

import jax
import jax.numpy as jnp
from jax.experimental import pallas as pl
from jax.experimental.pallas import tpu as pltpu

LANE = 128


def _round_up(x, m):
    return ((x + m - 1) // m) * m


# ----------------------------- fused path (fits in VMEM) ----------------------

def fused_conv_bn_relu_kernel(p_ref, w_ref, gb_ref, o_ref, *, rows_real, eps):
    """conv (one MXU matmul) + batch-stat BN + ReLU, entirely in VMEM."""
    # p_ref:  (rows_pad, Kp)  im2col patches (bf16 or f32)
    # w_ref:  (Kp, Cp)        flattened 3x3 weights, Cout zero-padded to Cp
    # gb_ref: (2, Cp)         [gamma; beta] (f32, padded)
    # o_ref:  (rows_pad, Cp)  f32 output
    acc = jnp.dot(p_ref[...], w_ref[...], preferred_element_type=jnp.float32)
    rows_pad = acc.shape[0]
    inv_cnt = 1.0 / float(rows_real)

    if rows_pad != rows_real:          # static: only emitted if rows were padded
        rid = jax.lax.broadcasted_iota(jnp.int32, (rows_pad, 1), 0)
        mask = rid < rows_real
        accm = jnp.where(mask, acc, 0.0)
    else:
        mask = None
        accm = acc

    mean = jnp.sum(accm, axis=0, keepdims=True) * inv_cnt           # (1, Cp)
    diff = acc - mean
    if mask is not None:
        diff = jnp.where(mask, diff, 0.0)
    var = jnp.sum(diff * diff, axis=0, keepdims=True) * inv_cnt     # (1, Cp)

    scale = gb_ref[0:1, :] * jax.lax.rsqrt(var + eps)
    shift = gb_ref[1:2, :] - mean * scale
    o_ref[...] = jnp.maximum(acc * scale + shift, 0.0).astype(o_ref.dtype)


# -------------------- two-pass fallback (rows too big for VMEM) ---------------

def conv_stats_kernel(p_ref, w_ref, y_ref, stats_ref, *, rows_real, row_tile, masked):
    # p_ref: (row_tile, Kp); w_ref: (Kp, Cp); y_ref: (row_tile, Cp) (bf16/f32)
    # stats_ref: (1, 2, Cp)  per-tile [sum, sum_sq] taken from the f32 accumulator
    acc = jnp.dot(p_ref[...], w_ref[...], preferred_element_type=jnp.float32)
    y_ref[...] = acc.astype(y_ref.dtype)
    stats_ref[0, 0:1, :] = jnp.sum(acc, axis=0, keepdims=True)
    stats_ref[0, 1:2, :] = jnp.sum(acc * acc, axis=0, keepdims=True)

    if masked:   # static: only the final (padded) tile pays for the mask
        @pl.when(pl.program_id(0) == pl.num_programs(0) - 1)
        def _():
            row0 = pl.program_id(0) * row_tile
            rid = row0 + jax.lax.broadcasted_iota(jnp.int32, (row_tile, 1), 0)
            accm = jnp.where(rid < rows_real, acc, 0.0)
            stats_ref[0, 0:1, :] = jnp.sum(accm, axis=0, keepdims=True)
            stats_ref[0, 1:2, :] = jnp.sum(accm * accm, axis=0, keepdims=True)


def bn_relu_kernel(y_ref, ss_ref, o_ref):
    # y_ref: (row_tile, Cp); ss_ref: (2, Cp) = [scale; shift]; o_ref: f32
    y = y_ref[...].astype(jnp.float32)
    o_ref[...] = jnp.maximum(y * ss_ref[0:1, :] + ss_ref[1:2, :], 0.0)


# ----------------------------------- wrapper ----------------------------------

def simple_net_forward(x_nchw, w_oihw, bias, gamma, beta, *, eps=1e-5,
                       compute_dtype=jnp.bfloat16, row_tile=4096,
                       force_two_pass=False):
    """Forward pass matching PyTorch SimpleNet (fresh module, training mode)."""
    # Conv bias is intentionally unused: training-mode BatchNorm subtracts the
    # per-channel batch mean, so a per-channel constant added by the conv bias
    # cancels exactly and the forward activation is mathematically unchanged.
    del bias
    # TODO(synk): PyTorch training mode also updates running_mean/running_var
    # buffers (where the bias would matter); only the forward activation is
    # produced here.

    N, Cin, H, W = x_nchw.shape
    Cout = w_oihw.shape[0]
    cdt = jnp.dtype(compute_dtype)
    assert cdt in (jnp.dtype(jnp.float32), jnp.dtype(jnp.bfloat16))

    Cp = _round_up(Cout, LANE)                 # lane-dense channel padding
    K = 9 * Cin
    sub = 16 if cdt == jnp.dtype(jnp.bfloat16) else 8
    Kp = _round_up(K, sub)                     # sublane-aligned contraction dim

    # --- im2col via one XLA op; output feature order is (cin, ky, kx) ----------
    # TODO(synk): for very large images, gather the 3x3 halo in-kernel (manual
    # make_async_copy of row_tile+2 image rows) instead of materializing the 9x
    # patches array in HBM.
    patches = jax.lax.conv_general_dilated_patches(
        x_nchw.astype(cdt), (3, 3), (1, 1), ((1, 1), (1, 1)),
        dimension_numbers=("NCHW", "OIHW", "NHWC"),
        precision=jax.lax.Precision.HIGHEST)            # (N, H, W, 9*Cin)
    rows = N * H * W
    patches2d = patches.reshape(rows, K)

    # weights (OIHW) -> (cin, ky, kx, cout) -> (K, Cout), zero-padded to (Kp, Cp)
    w_mat = jnp.transpose(w_oihw, (1, 2, 3, 0)).astype(jnp.float32).reshape(K, Cout)
    w_p = jnp.pad(w_mat, ((0, Kp - K), (0, Cp - Cout))).astype(cdt)

    g_p = jnp.pad(gamma.astype(jnp.float32), (0, Cp - Cout))
    b_p = jnp.pad(beta.astype(jnp.float32), (0, Cp - Cout))

    # Fuse when the f32 accumulator + output + patches comfortably fit in VMEM.
    rows8 = _round_up(rows, 8)
    est_bytes = rows8 * (Kp * cdt.itemsize + 3 * Cp * 4)
    use_fused = (not force_two_pass) and est_bytes <= (8 << 20)

    if use_fused:
        rows_pad = rows8
        patches2d = jnp.pad(patches2d, ((0, rows_pad - rows), (0, Kp - K)))
        gb = jnp.stack([g_p, b_p], axis=0)                       # (2, Cp)
        out2d = pl.pallas_call(
            functools.partial(fused_conv_bn_relu_kernel, rows_real=rows, eps=eps),
            out_shape=jax.ShapeDtypeStruct((rows_pad, Cp), jnp.float32),
            grid=(1,),
            in_specs=[
                pl.BlockSpec((rows_pad, Kp), lambda i: (0, 0)),
                pl.BlockSpec((Kp, Cp), lambda i: (0, 0)),
                pl.BlockSpec((2, Cp), lambda i: (0, 0)),
            ],
            out_specs=pl.BlockSpec((rows_pad, Cp), lambda i: (0, 0)),
        )(patches2d, w_p, gb)
    else:
        # ----- pass 1: conv per row tile + per-tile BN partial stats -----------
        rt = max(8, min(_round_up(row_tile, 8), _round_up(rows, 8), 8192))
        nt = pl.cdiv(rows, rt)
        rows_pad = nt * rt
        patches2d = jnp.pad(patches2d, ((0, rows_pad - rows), (0, Kp - K)))
        y2d, part = pl.pallas_call(
            functools.partial(conv_stats_kernel, rows_real=rows, row_tile=rt,
                              masked=(rows_pad != rows)),
            out_shape=(jax.ShapeDtypeStruct((rows_pad, Cp), cdt),
                       jax.ShapeDtypeStruct((nt, 2, Cp), jnp.float32)),
            grid=(nt,),
            in_specs=[
                pl.BlockSpec((rt, Kp), lambda t: (t, 0)),
                pl.BlockSpec((Kp, Cp), lambda t: (0, 0)),
            ],
            out_specs=(
                pl.BlockSpec((rt, Cp), lambda t: (t, 0)),
                pl.BlockSpec((1, 2, Cp), lambda t: (t, 0, 0)),
            ),
            compiler_params=pltpu.CompilerParams(
                dimension_semantics=("parallel",)),
        )(patches2d, w_p)

        # ----- fold global batch stats + gamma/beta into (2, Cp) scale/shift ---
        sums = jnp.sum(part, axis=0)                             # (2, Cp)
        cnt = jnp.float32(rows)
        mean = sums[0] / cnt
        var = jnp.maximum(sums[1] / cnt - mean * mean, 0.0)      # biased (training)
        # TODO(synk): for huge row counts a per-tile Welford (count, mean, M2)
        # merge is more robust than E[x^2] - E[x]^2.
        scale = g_p * jax.lax.rsqrt(var + eps)
        shift = b_p - mean * scale
        ss = jnp.stack([scale, shift], axis=0)                   # (2, Cp)

        # ----- pass 2: y * scale + shift, ReLU (lane-dense, row-tiled) ---------
        out2d = pl.pallas_call(
            bn_relu_kernel,
            out_shape=jax.ShapeDtypeStruct((rows_pad, Cp), jnp.float32),
            grid=(nt,),
            in_specs=[
                pl.BlockSpec((rt, Cp), lambda t: (t, 0)),
                pl.BlockSpec((2, Cp), lambda t: (0, 0)),
            ],
            out_specs=pl.BlockSpec((rt, Cp), lambda t: (t, 0)),
            compiler_params=pltpu.CompilerParams(
                dimension_semantics=("parallel",)),
            # write in place over the intermediate when dtypes match
            input_output_aliases=({0: 0} if cdt == jnp.dtype(jnp.float32) else {}),
        )(y2d, ss)

    # back to PyTorch NCHW, dropping row/channel padding
    out = out2d[:rows, :Cout].reshape(N, H, W, Cout)
    return jnp.transpose(out, (0, 3, 1, 2))


def reference_forward(x, w, b, gamma, beta, eps=1e-5):
    """Pure-JAX reference (same semantics as the PyTorch module in training mode)."""
    y = jax.lax.conv_general_dilated(
        x, w, window_strides=(1, 1), padding=((1, 1), (1, 1)),
        dimension_numbers=("NCHW", "OIHW", "NCHW")) + b.reshape(1, -1, 1, 1)
    mean = y.mean(axis=(0, 2, 3), keepdims=True)
    var = ((y - mean) ** 2).mean(axis=(0, 2, 3), keepdims=True)
    yh = (y - mean) / jnp.sqrt(var + eps)
    return jnp.maximum(yh * gamma.reshape(1, -1, 1, 1) + beta.reshape(1, -1, 1, 1), 0.0)


if __name__ == "__main__":
    N, Cin, Cout, H, W = 2, 4, 8, 16, 16

    key = jax.random.PRNGKey(0)
    kx, kw, kb = jax.random.split(key, 3)

    x = jax.random.normal(kx, (N, Cin, H, W), dtype=jnp.float32)
    # Deterministic synthetic params (shapes match nn.Conv2d(Cin,Cout,3) + BatchNorm2d(Cout)).
    w = 0.1 * jax.random.normal(kw, (Cout, Cin, 3, 3), dtype=jnp.float32)
    b = 0.01 * jax.random.normal(kb, (Cout,), dtype=jnp.float32)
    gamma = jnp.ones((Cout,), dtype=jnp.float32)   # BatchNorm2d default weight
    beta = jnp.zeros((Cout,), dtype=jnp.float32)   # BatchNorm2d default bias

    ref = reference_forward(x, w, b, gamma, beta)

    configs = [
        ("fused-bf16", dict(compute_dtype=jnp.bfloat16, force_two_pass=False), 2e-2),
        ("fused-f32", dict(compute_dtype=jnp.float32, force_two_pass=False), 1e-4),
        ("two-pass-bf16", dict(compute_dtype=jnp.bfloat16, force_two_pass=True), 2e-2),
        ("two-pass-f32", dict(compute_dtype=jnp.float32, force_two_pass=True), 1e-4),
    ]
    for name, kwargs, tol in configs:
        fwd = jax.jit(functools.partial(simple_net_forward, **kwargs))
        out = jax.block_until_ready(fwd(x, w, b, gamma, beta))
        assert out.shape == (N, Cout, H, W), name
        assert jnp.allclose(out, ref, atol=tol, rtol=tol), f"mismatch vs reference: {name}"

    print("KERNEL_OK")
</pallas_src>

<mosaic_0001>
module attributes {stable_mosaic.version = 11 : i64} {
  func.func @fused_conv_bn_relu_kernel(%arg0: i32, %arg1: memref<512x48xbf16, #tpu.memory_space<vmem>>, %arg2: memref<48x128xbf16, #tpu.memory_space<vmem>>, %arg3: memref<2x128xf32, #tpu.memory_space<vmem>>, %arg4: memref<512x128xf32, #tpu.memory_space<vmem>>) attributes {dimension_semantics = [#tpu.dimension_semantics<arbitrary>], iteration_bounds = array<i64: 1>, scalar_prefetch = 0 : i64, scratch_operands = 0 : i64, tpu.core_type = #tpu.core_type<tc>, window_params = [{pipeline_mode = #tpu.pipeline_mode<synchronous>, transform_indices = @transform_0, window_bounds = array<i64: 512, 48>}, {pipeline_mode = #tpu.pipeline_mode<synchronous>, transform_indices = @transform_1, window_bounds = array<i64: 48, 128>}, {pipeline_mode = #tpu.pipeline_mode<synchronous>, transform_indices = @transform_2, window_bounds = array<i64: 2, 128>}, {pipeline_mode = #tpu.pipeline_mode<synchronous>, transform_indices = @transform_3, window_bounds = array<i64: 512, 128>}]} {
    %c0 = arith.constant 0 : index
    %c0_0 = arith.constant 0 : index
    %0 = vector.load %arg1[%c0, %c0_0] : memref<512x48xbf16, #tpu.memory_space<vmem>>, vector<512x48xbf16>
    %c0_1 = arith.constant 0 : index
    %c0_2 = arith.constant 0 : index
    %1 = vector.load %arg2[%c0_1, %c0_2] : memref<48x128xbf16, #tpu.memory_space<vmem>>, vector<48x128xbf16>
    %cst = arith.constant dense<0.000000e+00> : vector<512x128xf32>
    %2 = tpu.matmul %0, %1, %cst {dimension_numbers = #tpu.dot_dimension_numbers<[1], [0], [0], [1], [0, 0, 1, 1], [], []>} : vector<512x48xbf16>, vector<48x128xbf16>, vector<512x128xf32> -> vector<512x128xf32>
    %cst_3 = arith.constant dense<0.000000e+00> : vector<128xf32>
    %3 = vector.multi_reduction <add>, %2, %cst_3 [0] : vector<512x128xf32> to vector<128xf32>
    %4 = vector.shape_cast %3 : vector<128xf32> to vector<1x128xf32>
    %cst_4 = arith.constant 0.001953125 : f32
    %5 = vector.broadcast %cst_4 : f32 to vector<1x128xf32>
    %6 = arith.mulf %4, %5 : vector<1x128xf32>
    %7 = vector.broadcast %6 : vector<1x128xf32> to vector<512x128xf32>
    %8 = arith.subf %2, %7 : vector<512x128xf32>
    %9 = arith.mulf %8, %8 : vector<512x128xf32>
    %cst_5 = arith.constant dense<0.000000e+00> : vector<128xf32>
    %10 = vector.multi_reduction <add>, %9, %cst_5 [0] : vector<512x128xf32> to vector<128xf32>
    %11 = vector.shape_cast %10 : vector<128xf32> to vector<1x128xf32>
    %cst_6 = arith.constant 0.001953125 : f32
    %12 = vector.broadcast %cst_6 : f32 to vector<1x128xf32>
    %13 = arith.mulf %11, %12 : vector<1x128xf32>
    %c0_7 = arith.constant 0 : index
    %c0_8 = arith.constant 0 : index
    %14 = vector.load %arg3[%c0_7, %c0_8] : memref<2x128xf32, #tpu.memory_space<vmem>>, vector<1x128xf32>
    %cst_9 = arith.constant 9.99999974E-6 : f32
    %15 = vector.broadcast %cst_9 : f32 to vector<1x128xf32>
    %16 = arith.addf %13, %15 : vector<1x128xf32>
    %17 = math.rsqrt %16 : vector<1x128xf32>
    %18 = arith.mulf %14, %17 : vector<1x128xf32>
    %c1 = arith.constant 1 : index
    %c0_10 = arith.constant 0 : index
    %19 = vector.load %arg3[%c1, %c0_10] : memref<2x128xf32, #tpu.memory_space<vmem>>, vector<1x128xf32>
    %20 = arith.mulf %6, %18 : vector<1x128xf32>
    %21 = arith.subf %19, %20 : vector<1x128xf32>
    %22 = vector.broadcast %18 : vector<1x128xf32> to vector<512x128xf32>
    %23 = arith.mulf %2, %22 : vector<512x128xf32>
    %24 = vector.broadcast %21 : vector<1x128xf32> to vector<512x128xf32>
    %25 = arith.addf %23, %24 : vector<512x128xf32>
    %cst_11 = arith.constant 0.000000e+00 : f32
    %26 = vector.broadcast %cst_11 : f32 to vector<512x128xf32>
    %27 = arith.maximumf %25, %26 : vector<512x128xf32>
    %c0_12 = arith.constant 0 : index
    %c0_13 = arith.constant 0 : index
    %28 = vector.load %arg4[%c0_12, %c0_13] : memref<512x128xf32, #tpu.memory_space<vmem>>, vector<512x128xf32>
    tpu.vector_store %arg4[%c0_12, %c0_13], %27 {strides = array<i32>} : memref<512x128xf32, #tpu.memory_space<vmem>>, vector<512x128xf32>,
    return
  }
  func.func @transform_0(%arg0: i32) -> (i32, i32) {
    %c0_i32 = arith.constant 0 : i32
    %c0_i32_0 = arith.constant 0 : i32
    %c0_i32_1 = arith.constant 0 : i32
    return %c0_i32, %c0_i32_0 : i32, i32
  }
  func.func @transform_1(%arg0: i32) -> (i32, i32) {
    %c0_i32 = arith.constant 0 : i32
    %c0_i32_0 = arith.constant 0 : i32
    %c0_i32_1 = arith.constant 0 : i32
    return %c0_i32, %c0_i32_0 : i32, i32
  }
  func.func @transform_2(%arg0: i32) -> (i32, i32) {
    %c0_i32 = arith.constant 0 : i32
    %c0_i32_0 = arith.constant 0 : i32
    %c0_i32_1 = arith.constant 0 : i32
    return %c0_i32, %c0_i32_0 : i32, i32
  }
  func.func @transform_3(%arg0: i32) -> (i32, i32) {
    %c0_i32 = arith.constant 0 : i32
    %c0_i32_0 = arith.constant 0 : i32
    %c0_i32_1 = arith.constant 0 : i32
    return %c0_i32, %c0_i32_0 : i32, i32
  }
}

</mosaic_0001>

<bundles_post_ra>
// kernel: simple_net_forward.1
= control target key start
LH: loop header
LB: loop body
LE: loop exit
PB: predicated region body
PF: predicated region fallthrough
CT: control target
= control target key end

     0   :  { %vm263_vm0 = vcmask 392192   ;;  %s2681_s1 = inlined_call_operand.vmem [shape: bf16[48,128], index: 1, kind: input, shape index: {}]   ;;  %s2682_s0 = inlined_call_operand.vmem [shape: bf16[512,48], index: 0, kind: input, shape index: {}]   ;;  %s2683_s2 = inlined_call_operand.vmem [shape: f32[2,128], index: 2, kind: input, shape index: {}]   ;;  %s2684_s3 = inlined_call_operand.vmem [shape: f32[512,128], index: 3, kind: output, shape index: {}]  }
   0x1   :  { %v1370_v0 = vld [vmem:[%s2681_s1] sm:$0xff]   ;;  %v1371_v1 = vld [vmem:[%s2681_s1 + $0x8] sm:$0xff]   ;;  %v1372_v3 = vld [vmem:[%s2681_s1 + $0x10] sm:$0xff]  }
   0x2   :  { %1294 = vmatprep.subr.bf16.mxu0 %v1370_v0  ;;  %1364 = vmatprep.subr.bf16.mxu1 %v1370_v0  ;;  %v1373_v2 = vld [vmem:[%s2682_s0] sm:$0xff]   ;;  %v1374_v4 = vld [vmem:[%s2682_s0 + $0x8] sm:$0xff]   ;;  %v1375_v5 = vld [vmem:[%s2682_s0 + $0x10] sm:$0xff]  }
   0x3   :  { %1295 = vmatpush3.bf16.msra.mxu0 %v1370_v0  ;;  %1367 = vmatpush3.bf16.msra.mxu1 %v1370_v0  ;;  %v1376_v6 = vld [vmem:[%s2682_s0 + $0x18] sm:$0xff]   ;;  %v1377_v7 = vld [vmem:[%s2682_s0 + $0x20] sm:$0xff]   ;;  %v1390_v9 = vld [vmem:[%s2682_s0 + $0x88] sm:$0xff]  }
   0x4   :  { %1296 = vmatprep.subr.bf16.mxu0 %v1371_v1  ;;  %1365 = vmatprep.subr.bf16.mxu1 %v1371_v1  ;;  %v1389_v8 = vld [vmem:[%s2682_s0 + $0x80] sm:$0xff]   ;;  %v1391_v10 = vld [vmem:[%s2682_s0 + $0x90] sm:$0xff]   ;;  %v1378_v11 = vld [vmem:[%s2682_s0 + $0x28] sm:$0xff]  }
   0x5   :  { %1300 = vmatprep.mubr.msk.bf16.mxu0 %vm263_vm0, %v1373_v2  ;;  %1332 = vmatprep.mubr.msk.bf16.mxu1 %vm263_vm0, %v1389_v8  ;;  %v1379_v12 = vld [vmem:[%s2682_s0 + $0x30] sm:$0xff]   ;;  %v1392_v13 = vld [vmem:[%s2682_s0 + $0x98] sm:$0xff]   ;;  %v1393_v14 = vld [vmem:[%s2682_s0 + $0xa0] sm:$0xff]  }
   0x6   :  { %v1380_v15 = vld [vmem:[%s2682_s0 + $0x38] sm:$0xff]   ;;  %v1394_v16 = vld [vmem:[%s2682_s0 + $0xa8] sm:$0xff]   ;;  %v1381_v17 = vld [vmem:[%s2682_s0 + $0x40] sm:$0xff]  }
   0x7   :  { %1297 = vmatpush3.bf16.msra.mxu0 %v1371_v1  ;;  %1368 = vmatpush3.bf16.msra.mxu1 %v1371_v1  ;;  %v1395_v18 = vld [vmem:[%s2682_s0 + $0xb0] sm:$0xff]   ;;  %v1382_v19 = vld [vmem:[%s2682_s0 + $0x48] sm:$0xff]   ;;  %v1396_v20 = vld [vmem:[%s2682_s0 + $0xb8] sm:$0xff]  }
   0x8   :  { %1298 = vmatprep.subr.bf16.mxu0 %v1372_v3  ;;  %1366 = vmatprep.subr.bf16.mxu1 %v1372_v3  ;;  %v1383_v21 = vld [vmem:[%s2682_s0 + $0x50] sm:$0xff]   ;;  %v1397_v22 = vld [vmem:[%s2682_s0 + $0xc0] sm:$0xff]   ;;  %v1384_v23 = vld [vmem:[%s2682_s0 + $0x58] sm:$0xff]  }
   0x9   :  { %v1398_v24 = vld [vmem:[%s2682_s0 + $0xc8] sm:$0xff]   ;;  %v1385_v25 = vld [vmem:[%s2682_s0 + $0x60] sm:$0xff]   ;;  %v1399_v26 = vld [vmem:[%s2682_s0 + $0xd0] sm:$0xff]  }
   0xa   :  { %v1386_v27 = vld [vmem:[%s2682_s0 + $0x68] sm:$0xff]   ;;  %v1400_v28 = vld [vmem:[%s2682_s0 + $0xd8] sm:$0xff]   ;;  %v1387_v29 = vld [vmem:[%s2682_s0 + $0x70] sm:$0xff]  }
   0xb   :  { %1299 = vmatpush3.bf16.msra.mxu0 %v1372_v3  ;;  %1369 = vmatpush3.bf16.msra.mxu1 %v1372_v3  ;;  %v1401_v30 = vld [vmem:[%s2682_s0 + $0xe0] sm:$0xff]   ;;  %v1388_v31 = vld [vmem:[%s2682_s0 + $0x78] sm:$0xff]   ;;  %v1402_v32 = vld [vmem:[%s2682_s0 + $0xe8] sm:$0xff]  }
   0xc   :  { %v1403_v33 = vld [vmem:[%s2682_s0 + $0xf0] sm:$0xff]   ;;  %v1404_v34 = vld [vmem:[%s2682_s0 + $0xf8] sm:$0xff]  }
   0xe   :  { %1301 = vmatmul.mubr.msk.bf16.vlgmr.msra.gmra.mrb[0].mxu0 %vm263_vm0, %v1374_v4  ;;  %1333 = vmatmul.mubr.msk.bf16.vlgmr.msra.gmra.mrb[0].mxu1 %vm263_vm0, %v1390_v9 }
   0xf   :  { %1304 = vmatprep.mubr.msk.bf16.mxu0 %vm263_vm0, %v1375_v5  ;;  %1336 = vmatprep.mubr.msk.bf16.mxu1 %vm263_vm0, %v1391_v10 }
  0x16   :  { %1305 = vmatmul.mubr.msk.bf16.gmra.mrb[4].mxu0 %vm263_vm0, %v1376_v6  ;;  %1337 = vmatmul.mubr.msk.bf16.gmra.mrb[4].mxu1 %vm263_vm0, %v1392_v13 }
  0x17   :  { %1308 = vmatprep.mubr.msk.bf16.mxu0 %vm263_vm0, %v1377_v7  ;;  %1340 = vmatprep.mubr.msk.bf16.mxu1 %vm263_vm0, %v1393_v14 }
  0x1e   :  { %1309 = vmatmul.mubr.msk.bf16.gmra.mrb[8].mxu0 %vm263_vm0, %v1378_v11  ;;  %1341 = vmatmul.mubr.msk.bf16.gmra.mrb[8].mxu1 %vm263_vm0, %v1394_v16 }
  0x1f   :  { %1312 = vmatprep.mubr.msk.bf16.mxu0 %vm263_vm0, %v1379_v12  ;;  %1344 = vmatprep.mubr.msk.bf16.mxu1 %vm263_vm0, %v1395_v18 }
  0x26   :  { %1313 = vmatmul.mubr.msk.bf16.gmra.mrb[12].mxu0 %vm263_vm0, %v1380_v15  ;;  %1345 = vmatmul.mubr.msk.bf16.gmra.mrb[12].mxu1 %vm263_vm0, %v1396_v20 }
  0x27   :  { %1316 = vmatprep.mubr.msk.bf16.mxu0 %vm263_vm0, %v1381_v17  ;;  %1348 = vmatprep.mubr.msk.bf16.mxu1 %vm263_vm0, %v1397_v22 }
  0x2e   :  { %1317 = vmatmul.mubr.msk.bf16.gmra.mrb[16].mxu0 %vm263_vm0, %v1382_v19  ;;  %1349 = vmatmul.mubr.msk.bf16.gmra.mrb[16].mxu1 %vm263_vm0, %v1398_v24 }
  0x2f   :  { %1320 = vmatprep.mubr.msk.bf16.mxu0 %vm263_vm0, %v1383_v21  ;;  %1352 = vmatprep.mubr.msk.bf16.mxu1 %vm263_vm0, %v1399_v26 }
  0x36   :  { %1321 = vmatmul.mubr.msk.bf16.gmra.mrb[20].mxu0 %vm263_vm0, %v1384_v23  ;;  %1353 = vmatmul.mubr.msk.bf16.gmra.mrb[20].mxu1 %vm263_vm0, %v1400_v28 }
  0x37   :  { %1324 = vmatprep.mubr.msk.bf16.mxu0 %vm263_vm0, %v1385_v25  ;;  %1356 = vmatprep.mubr.msk.bf16.mxu1 %vm263_vm0, %v1401_v30 }
  0x3e   :  { %1325 = vmatmul.mubr.msk.bf16.gmra.mrb[24].mxu0 %vm263_vm0, %v1386_v27  ;;  %1357 = vmatmul.mubr.msk.bf16.gmra.mrb[24].mxu1 %vm263_vm0, %v1402_v32 }
  0x3f   :  { %1328 = vmatprep.mubr.msk.bf16.mxu0 %vm263_vm0, %v1387_v29  ;;  %1360 = vmatprep.mubr.msk.bf16.mxu1 %vm263_vm0, %v1403_v33 }
  0x46   :  { %1329 = vmatmul.mubr.msk.bf16.gmra.mrb[28].mxu0 %vm263_vm0, %v1388_v31  ;;  %1361 = vmatmul.mubr.msk.bf16.gmra.mrb[28].mxu1 %vm263_vm0, %v1404_v34 }
  0xe1   :  { %v1564_v35 = vpop.f32.mrb[0].mxu0  ;;  %v1578_v43 = vpop.f32.mrb[0].mxu1 }
  0xe2   :  { %2733 = vst [vmem:[#allocation2_spill] sm:$0xff] %v1564_v35  ;;  %v1566_v36 = vpop.f32.mrb[1].mxu0  ;;  %v1582_v45 = vpop.f32.mrb[1].mxu1 }
  0xe3   :  { %v1568_v37 = vpop.f32.mrb[2].mxu0  ;;  %2736 = vst [vmem:[#allocation5_spill] sm:$0xff] %v1582_v45  ;;  %v1587_v48 = vpop.f32.mrb[2].mxu1 }
  0xe4   :  { %2734 = vst [vmem:[#allocation3_spill] sm:$0xff] %v1568_v37  ;;  %v1570_v38 = vpop.f32.mrb[3].mxu0  ;;  %v1591_v50 = vpop.f32.mrb[3].mxu1 }
  0xe5   :  { %v649_v39 = vadd.f32 %v1570_v38, %v1566_v36 }
  0xe7   :  { %v650_v40 = vadd.f32 %v1564_v35, %v649_v39 }
  0xe9   :  { %v1575_v41 = vpop.f32.mrb[4].mxu0  ;;  %v651_v42 = vadd.f32 %v1568_v37, %v650_v40  ;;  %v1598_v55 = vpop.f32.mrb[4].mxu1 }
  0xea   :  { %v1580_v44 = vpop.f32.mrb[5].mxu0  ;;  %v1602_v57 = vpop.f32.mrb[5].mxu1 }
  0xeb   :  { %2735 = vst [vmem:[#allocation4_spill] sm:$0xff] %v1580_v44  ;;  %v652_v46 = vadd.f32 %v651_v42, %v1580_v44  ;;  %v1585_v47 = vpop.f32.mrb[6].mxu0  ;;  %v1607_v60 = vpop.f32.mrb[6].mxu1 }
  0xec   :  { %v1589_v49 = vpop.f32.mrb[7].mxu0  ;;  %v1611_v62 = vpop.f32.mrb[7].mxu1 }
  0xed   :  { %v653_v51 = vadd.f32 %v652_v46, %v1589_v49 }
  0xef   :  { %v654_v52 = vadd.f32 %v1575_v41, %v653_v51 }
  0xf1   :  { %v1595_v53 = vpop.f32.mrb[8].mxu0  ;;  %v655_v54 = vadd.f32 %v1585_v47, %v654_v52  ;;  %v1618_v3 = vpop.f32.mrb[8].mxu1 }
  0xf2   :  { %v1600_v56 = vpop.f32.mrb[9].mxu0  ;;  %v1622_v5 = vpop.f32.mrb[9].mxu1 }
  0xf3   :  { %v656_v58 = vadd.f32 %v655_v54, %v1600_v56  ;;  %v1605_v59 = vpop.f32.mrb[10].mxu0  ;;  %v1627_v8 = vpop.f32.mrb[10].mxu1 }
  0xf4   :  { %v1609_v61 = vpop.f32.mrb[11].mxu0  ;;  %v1631_v10 = vpop.f32.mrb[11].mxu1 }
  0xf5   :  { %v657_v63 = vadd.f32 %v656_v58, %v1609_v61 }
  0xf7   :  { %v658_v0 = vadd.f32 %v1595_v53, %v657_v63 }
  0xf9   :  { %v1615_v1 = vpop.f32.mrb[12].mxu0  ;;  %v659_v2 = vadd.f32 %v1605_v59, %v658_v0  ;;  %v1638_v15 = vpop.f32.mrb[12].mxu1 }
  0xfa   :  { %v1620_v4 = vpop.f32.mrb[13].mxu0  ;;  %v1642_v17 = vpop.f32.mrb[13].mxu1 }
  0xfb   :  { %v660_v6 = vadd.f32 %v659_v2, %v1620_v4  ;;  %v1625_v7 = vpop.f32.mrb[14].mxu0  ;;  %v1647_v20 = vpop.f32.mrb[14].mxu1 }
  0xfc   :  { %v1629_v9 = vpop.f32.mrb[15].mxu0  ;;  %v1651_v22 = vpop.f32.mrb[15].mxu1 }
  0xfd   :  { %v661_v11 = vadd.f32 %v660_v6, %v1629_v9 }
  0xff   :  { %v662_v12 = vadd.f32 %v1615_v1, %v661_v11 }
 0x101   :  { %v1635_v13 = vpop.f32.mrb[16].mxu0  ;;  %v663_v14 = vadd.f32 %v1625_v7, %v662_v12  ;;  %v1658_v27 = vpop.f32.mrb[16].mxu1 }
 0x102   :  { %2737 = vst [vmem:[#allocation6_spill] sm:$0xff] %v1635_v13  ;;  %v1640_v16 = vpop.f32.mrb[17].mxu0  ;;  %2740 = vst [vmem:[#allocation9_spill] sm:$0xff] %v1658_v27  ;;  %v1662_v29 = vpop.f32.mrb[17].mxu1 }
 0x103   :  { %v664_v18 = vadd.f32 %v663_v14, %v1640_v16  ;;  %v1645_v19 = vpop.f32.mrb[18].mxu0  ;;  %v1667_v32 = vpop.f32.mrb[18].mxu1 }
 0x104   :  { %2738 = vst [vmem:[#allocation7_spill] sm:$0xff] %v1645_v19  ;;  %v1649_v21 = vpop.f32.mrb[19].mxu0  ;;  %2743 = vst [vmem:[#allocation12_spill] sm:$0xff] %v1667_v32  ;;  %v1671_v34 = vpop.f32.mrb[19].mxu1 }
 0x105   :  { %v665_v23 = vadd.f32 %v664_v18, %v1649_v21  ;;  %2745 = vst [vmem:[#allocation14_spill] sm:$0xff] %v1671_v34 }
 0x107   :  { %v666_v24 = vadd.f32 %v1635_v13, %v665_v23 }
 0x109   :  { %v1655_v25 = vpop.f32.mrb[20].mxu0  ;;  %v667_v26 = vadd.f32 %v1645_v19, %v666_v24  ;;  %v1678_v51 = vpop.f32.mrb[20].mxu1 }
 0x10a   :  { %2739 = vst [vmem:[#allocation8_spill] sm:$0xff] %v1655_v25  ;;  %v1660_v28 = vpop.f32.mrb[21].mxu0  ;;  %2747 = vst [vmem:[#allocation16_spill] sm:$0xff] %v1678_v51  ;;  %v1682_v54 = vpop.f32.mrb[21].mxu1 }
 0x10b   :  { %2741 = vst [vmem:[#allocation10_spill] sm:$0xff] %v1660_v28  ;;  %v668_v30 = vadd.f32 %v667_v26, %v1660_v28  ;;  %v1665_v31 = vpop.f32.mrb[22].mxu0  ;;  %2749 = vst [vmem:[#allocation18_spill] sm:$0xff] %v1682_v54  ;;  %v1687_v0 = vpop.f32.mrb[22].mxu1 }
 0x10c   :  { %2742 = vst [vmem:[#allocation11_spill] sm:$0xff] %v1665_v31  ;;  %v1669_v33 = vpop.f32.mrb[23].mxu0  ;;  %2751 = vst [vmem:[#allocation20_spill] sm:$0xff] %v1687_v0  ;;  %v1691_v6 = vpop.f32.mrb[23].mxu1 }
 0x10d   :  { %2744 = vst [vmem:[#allocation13_spill] sm:$0xff] %v1669_v33  ;;  %v669_v39 = vadd.f32 %v668_v30, %v1669_v33  ;;  %2753 = vst [vmem:[#allocation22_spill] sm:$0xff] %v1691_v6 }
 0x10f   :  { %v670_v40 = vadd.f32 %v1655_v25, %v669_v39 }
 0x111   :  { %v1675_v42 = vpop.f32.mrb[24].mxu0  ;;  %v671_v46 = vadd.f32 %v1665_v31, %v670_v40  ;;  %v1698_v23 = vpop.f32.mrb[24].mxu1 }
 0x112   :  { %2746 = vst [vmem:[#allocation15_spill] sm:$0xff] %v1675_v42  ;;  %v1680_v52 = vpop.f32.mrb[25].mxu0  ;;  %2755 = vst [vmem:[#allocation24_spill] sm:$0xff] %v1698_v23  ;;  %v1702_v26 = vpop.f32.mrb[25].mxu1 }
 0x113   :  { %2748 = vst [vmem:[#allocation17_spill] sm:$0xff] %v1680_v52  ;;  %v672_v58 = vadd.f32 %v671_v46, %v1680_v52  ;;  %v1685_v63 = vpop.f32.mrb[26].mxu0  ;;  %2757 = vst [vmem:[#allocation26_spill] sm:$0xff] %v1702_v26  ;;  %v1707_v40 = vpop.f32.mrb[26].mxu1 }
 0x114   :  { %2750 = vst [vmem:[#allocation19_spill] sm:$0xff] %v1685_v63  ;;  %v1689_v2 = vpop.f32.mrb[27].mxu0  ;;  %2759 = vst [vmem:[#allocation28_spill] sm:$0xff] %v1707_v40 }
 0x115   :  { %2752 = vst [vmem:[#allocation21_spill] sm:$0xff] %v1689_v2  ;;  %v673_v11 = vadd.f32 %v672_v58, %v1689_v2  ;;  %v1711_v58 = vpop.f32.mrb[27].mxu1 }
 0x116   :  { %2761 = vst [vmem:[#allocation30_spill] sm:$0xff] %v1711_v58 }
 0x117   :  { %v674_v12 = vadd.f32 %v1675_v42, %v673_v11 }
 0x119   :  { %v1695_v14 = vpop.f32.mrb[28].mxu0  ;;  %v675_v18 = vadd.f32 %v1685_v63, %v674_v12  ;;  %v1716_v42 = vpop.f32.mrb[28].mxu1 }
 0x11a   :  { %2754 = vst [vmem:[#allocation23_spill] sm:$0xff] %v1695_v14  ;;  %v1700_v24 = vpop.f32.mrb[29].mxu0  ;;  %2762 = vst [vmem:[#allocation31_spill] sm:$0xff] %v1716_v42  ;;  %v1718_v2 = vpop.f32.mrb[29].mxu1 }
 0x11b   :  { %2756 = vst [vmem:[#allocation25_spill] sm:$0xff] %v1700_v24  ;;  %v676_v30 = vadd.f32 %v675_v18, %v1700_v24  ;;  %v1705_v39 = vpop.f32.mrb[30].mxu0  ;;  %2763 = vst [vmem:[#allocation32_spill] sm:$0xff] %v1718_v2  ;;  %v1721_v24 = vpop.f32.mrb[30].mxu1 }
 0x11c   :  { %2758 = vst [vmem:[#allocation27_spill] sm:$0xff] %v1705_v39  ;;  %v1709_v46 = vpop.f32.mrb[31].mxu0  ;;  %v1723_v52 = vpop.f32.mrb[31].mxu1 }
 0x11d   :  { %2760 = vst [vmem:[#allocation29_spill] sm:$0xff] %v1709_v46  ;;  %v677_v11 = vadd.f32 %v676_v30, %v1709_v46  ;;  %2764 = vst [vmem:[#allocation33_spill] sm:$0xff] %v1723_v52 }
 0x11f   :  { %v678_v12 = vadd.f32 %v1695_v14, %v677_v11 }
 0x121   :  { %v679_v63 = vadd.f32 %v1705_v39, %v678_v12 }
 0x123   :  { %v680_v18 = vadd.f32 %v679_v63, %v1582_v45 }
 0x125   :  { %v681_v31 = vadd.f32 %v680_v18, %v1591_v50 }
 0x127   :  { %v682_v25 = vadd.f32 %v1578_v43, %v681_v31 }
 0x129   :  { %v683_v30 = vadd.f32 %v1587_v48, %v682_v25 }
 0x12b   :  { %v684_v11 = vadd.f32 %v683_v30, %v1602_v57 }
 0x12d   :  { %v685_v12 = vadd.f32 %v684_v11, %v1611_v62 }
 0x12f   :  { %v686_v39 = vadd.f32 %v1598_v55, %v685_v12 }
 0x131   :  { %v687_v14 = vadd.f32 %v1607_v60, %v686_v39 }
 0x133   :  { %v688_v63 = vadd.f32 %v687_v14, %v1622_v5 }
 0x135   :  { %v689_v45 = vadd.f32 %v688_v63, %v1631_v10 }
 0x137   :  { %v690_v46 = vadd.f32 %v1618_v3, %v689_v45 }
 0x139   :  { %v691_v18 = vadd.f32 %v1627_v8, %v690_v46 }
 0x13b   :  { %v692_v31 = vadd.f32 %v691_v18, %v1642_v17 }
 0x13d   :  { %v693_v25 = vadd.f32 %v692_v31, %v1651_v22 }
 0x13f   :  { %v694_v30 = vadd.f32 %v1638_v15, %v693_v25 }
 0x141   :  { %v695_v11 = vadd.f32 %v1647_v20, %v694_v30 }
 0x143   :  { %v696_v12 = vadd.f32 %v695_v11, %v1662_v29 }
 0x145   :  { %v697_v39 = vadd.f32 %v696_v12, %v1671_v34 }
 0x147   :  { %v698_v14 = vadd.f32 %v1658_v27, %v697_v39 }
 0x149   :  { %v699_v63 = vadd.f32 %v1667_v32, %v698_v14 }
 0x14b   :  { %v700_v45 = vadd.f32 %v699_v63, %v1682_v54 }
 0x14d   :  { %v701_v46 = vadd.f32 %v700_v45, %v1691_v6 }
 0x14f   :  { %v702_v18 = vadd.f32 %v1678_v51, %v701_v46 }
 0x151   :  { %v703_v31 = vadd.f32 %v1687_v0, %v702_v18 }
 0x153   :  { %v704_v25 = vadd.f32 %v703_v31, %v1702_v26 }
 0x155   :  { %v705_v30 = vadd.f32 %v704_v25, %v1711_v58 }
 0x157   :  { %v706_v11 = vadd.f32 %v1698_v23, %v705_v30 }
 0x159   :  { %v707_v12 = vadd.f32 %v1707_v40, %v706_v11 }
 0x15b   :  { %v708_v39 = vadd.f32 %v707_v12, %v1718_v2 }
 0x15d   :  { %v709_v14 = vadd.f32 %v708_v39, %v1723_v52 }
 0x15f   :  { %v710_v63 = vadd.f32 %v1716_v42, %v709_v14 }
 0x161   :  { %v711_v45 = vadd.f32 %v1721_v24, %v710_v63 }
 0x163   :  { %v712_v6 = vrot.slane %v711_v45, 4 }
 0x165   :  { %v713_v46 = vadd.f32 %v712_v6, %v711_v45 }
 0x167   :  { %v714_v51 = vrot.slane %v713_v46, 2 }
 0x169   :  { %v715_v18 = vadd.f32 %v714_v51, %v713_v46 }
 0x16b   :  { %v716_v0 = vrot.slane %v715_v18, 1 }
 0x16d   :  { %v717_v31 = vadd.f32 %v716_v0, %v715_v18 }
 0x16f   :  { %v1756_v26 = vmul.f32 0.001953125, %v717_v31 }
 0x171   :  { %v719_v25 = vsub.f32 %v1566_v36, %v1756_v26  ;;  %v720_v30 = vsub.f32 %v1570_v38, %v1756_v26  ;;  %v721_v11 = vsub.f32 %v1564_v35, %v1756_v26  ;;  %v722_v6 = vsub.f32 %v1568_v37, %v1756_v26 }
 0x172   :  { %v723_v51 = vsub.f32 %v1580_v44, %v1756_v26  ;;  %v724_v63 = vsub.f32 %v1589_v49, %v1756_v26  ;;  %v725_v18 = vsub.f32 %v1575_v41, %v1756_v26  ;;  %v727_v44 = vsub.f32 %v1600_v56, %v1756_v26 }
 0x173   :  { %v783_v12 = vmul.f32 %v719_v25, %v719_v25  ;;  %v784_v39 = vmul.f32 %v720_v30, %v720_v30  ;;  %v785_v0 = vmul.f32 %v721_v11, %v721_v11  ;;  %v786_v45 = vmul.f32 %v722_v6, %v722_v6 }
 0x174   :  { %v787_v31 = vmul.f32 %v723_v51, %v723_v51  ;;  %v726_v25 = vsub.f32 %v1585_v47, %v1756_v26  ;;  %v788_v30 = vmul.f32 %v724_v63, %v724_v63  ;;  %v789_v11 = vmul.f32 %v725_v18, %v725_v18 }
 0x175   :  { %v847_v14 = vadd.f32 %v784_v39, %v783_v12  ;;  %v728_v39 = vsub.f32 %v1609_v61, %v1756_v26  ;;  %v791_v51 = vmul.f32 %v727_v44, %v727_v44 }
 0x176   :  { %v790_v6 = vmul.f32 %v726_v25, %v726_v25 }
 0x177   :  { %v848_v46 = vadd.f32 %v847_v14, %v785_v0  ;;  %v729_v14 = vsub.f32 %v1595_v53, %v1756_v26  ;;  %v792_v63 = vmul.f32 %v728_v39, %v728_v39 }
 0x179   :  { %v849_v35 = vadd.f32 %v848_v46, %v786_v45  ;;  %v730_v46 = vsub.f32 %v1605_v59, %v1756_v26  ;;  %v793_v18 = vmul.f32 %v729_v14, %v729_v14 }
 0x17b   :  { %v850_v37 = vadd.f32 %v849_v35, %v787_v31  ;;  %v731_v31 = vsub.f32 %v1620_v4, %v1756_v26  ;;  %v794_v25 = vmul.f32 %v730_v46, %v730_v46 }
 0x17d   :  { %v851_v12 = vadd.f32 %v850_v37, %v788_v30  ;;  %v732_v30 = vsub.f32 %v1629_v9, %v1756_v26  ;;  %v795_v44 = vmul.f32 %v731_v31, %v731_v31 }
 0x17f   :  { %v852_v0 = vadd.f32 %v851_v12, %v789_v11  ;;  %v733_v12 = vsub.f32 %v1615_v1, %v1756_v26  ;;  %v796_v39 = vmul.f32 %v732_v30, %v732_v30 }
 0x181   :  { %v853_v45 = vadd.f32 %v852_v0, %v790_v6  ;;  %v734_v0 = vsub.f32 %v1625_v7, %v1756_v26  ;;  %v797_v14 = vmul.f32 %v733_v12, %v733_v12 }
 0x183   :  { %v854_v35 = vadd.f32 %v853_v45, %v791_v51  ;;  %v735_v45 = vsub.f32 %v1640_v16, %v1756_v26  ;;  %v798_v46 = vmul.f32 %v734_v0, %v734_v0 }
 0x185   :  { %v855_v37 = vadd.f32 %v854_v35, %v792_v63  ;;  %v736_v35 = vsub.f32 %v1649_v21, %v1756_v26  ;;  %v799_v31 = vmul.f32 %v735_v45, %v735_v45 }
 0x187   :  { %v856_v11 = vadd.f32 %v855_v37, %v793_v18  ;;  %v737_v37 = vsub.f32 %v1635_v13, %v1756_v26  ;;  %v800_v30 = vmul.f32 %v736_v35, %v736_v35 }
 0x189   :  { %v857_v6 = vadd.f32 %v856_v11, %v794_v25  ;;  %v738_v11 = vsub.f32 %v1645_v19, %v1756_v26  ;;  %v801_v12 = vmul.f32 %v737_v37, %v737_v37 }
 0x18b   :  { %v858_v51 = vadd.f32 %v857_v6, %v795_v44  ;;  %v739_v6 = vsub.f32 %v1660_v28, %v1756_v26  ;;  %v802_v0 = vmul.f32 %v738_v11, %v738_v11 }
 0x18d   :  { %v859_v63 = vadd.f32 %v858_v51, %v796_v39  ;;  %v740_v51 = vsub.f32 %v1669_v33, %v1756_v26  ;;  %v803_v45 = vmul.f32 %v739_v6, %v739_v6 }
 0x18f   :  { %v860_v18 = vadd.f32 %v859_v63, %v797_v14  ;;  %v2765_v63 = vld [vmem:[#allocation8_spill] sm:$0xff]  ;;  %v804_v35 = vmul.f32 %v740_v51, %v740_v51 }
 0x190   :  { %v741_v13 = vsub.f32 %v2765_v63, %v1756_v26 }
 0x191   :  { %v861_v25 = vadd.f32 %v860_v18, %v798_v46  ;;  %v2766_v18 = vld [vmem:[#allocation11_spill] sm:$0xff] }
 0x192   :  { %v742_v19 = vsub.f32 %v2766_v18, %v1756_v26  ;;  %v805_v37 = vmul.f32 %v741_v13, %v741_v13 }
 0x193   :  { %v862_v44 = vadd.f32 %v861_v25, %v799_v31  ;;  %v2767_v25 = vld [vmem:[#allocation17_spill] sm:$0xff] }
 0x194   :  { %v743_v28 = vsub.f32 %v2767_v25, %v1756_v26  ;;  %v806_v11 = vmul.f32 %v742_v19, %v742_v19 }
 0x195   :  { %v863_v39 = vadd.f32 %v862_v44, %v800_v30  ;;  %v2768_v44 = vld [vmem:[#allocation21_spill] sm:$0xff] }
 0x196   :  { %v744_v33 = vsub.f32 %v2768_v44, %v1756_v26  ;;  %v807_v6 = vmul.f32 %v743_v28, %v743_v28 }
 0x197   :  { %v864_v14 = vadd.f32 %v863_v39, %v801_v12  ;;  %v2769_v39 = vld [vmem:[#allocation15_spill] sm:$0xff] }
 0x198   :  { %v745_v63 = vsub.f32 %v2769_v39, %v1756_v26  ;;  %v808_v51 = vmul.f32 %v744_v33, %v744_v33 }
 0x199   :  { %v865_v46 = vadd.f32 %v864_v14, %v802_v0  ;;  %v2770_v14 = vld [vmem:[#allocation19_spill] sm:$0xff] }
 0x19a   :  { %v746_v18 = vsub.f32 %v2770_v14, %v1756_v26  ;;  %v809_v13 = vmul.f32 %v745_v63, %v745_v63 }
 0x19b   :  { %v866_v31 = vadd.f32 %v865_v46, %v803_v45  ;;  %v2771_v46 = vld [vmem:[#allocation25_spill] sm:$0xff] }
 0x19c   :  { %v747_v25 = vsub.f32 %v2771_v46, %v1756_v26  ;;  %v810_v19 = vmul.f32 %v746_v18, %v746_v18 }
 0x19d   :  { %v867_v30 = vadd.f32 %v866_v31, %v804_v35  ;;  %v2772_v31 = vld [vmem:[#allocation29_spill] sm:$0xff] }
 0x19e   :  { %v748_v44 = vsub.f32 %v2772_v31, %v1756_v26  ;;  %v811_v28 = vmul.f32 %v747_v25, %v747_v25 }
 0x19f   :  { %v868_v12 = vadd.f32 %v867_v30, %v805_v37  ;;  %v2773_v30 = vld [vmem:[#allocation23_spill] sm:$0xff] }
 0x1a0   :  { %v749_v39 = vsub.f32 %v2773_v30, %v1756_v26  ;;  %v812_v33 = vmul.f32 %v748_v44, %v748_v44 }
 0x1a1   :  { %v869_v0 = vadd.f32 %v868_v12, %v806_v11  ;;  %v2774_v12 = vld [vmem:[#allocation27_spill] sm:$0xff] }
 0x1a2   :  { %v750_v14 = vsub.f32 %v2774_v12, %v1756_v26  ;;  %v813_v63 = vmul.f32 %v749_v39, %v749_v39 }
 0x1a3   :  { %v870_v45 = vadd.f32 %v869_v0, %v807_v6  ;;  %v2775_v0 = vld [vmem:[#allocation5_spill] sm:$0xff] }
 0x1a4   :  { %v751_v46 = vsub.f32 %v2775_v0, %v1756_v26  ;;  %v814_v18 = vmul.f32 %v750_v14, %v750_v14 }
 0x1a5   :  { %v871_v35 = vadd.f32 %v870_v45, %v808_v51  ;;  %v752_v45 = vsub.f32 %v1591_v50, %v1756_v26 }
 0x1a6   :  { %v815_v25 = vmul.f32 %v751_v46, %v751_v46 }
 0x1a7   :  { %v872_v37 = vadd.f32 %v871_v35, %v809_v13  ;;  %v753_v35 = vsub.f32 %v1578_v43, %v1756_v26  ;;  %v816_v44 = vmul.f32 %v752_v45, %v752_v45 }
 0x1a9   :  { %v873_v11 = vadd.f32 %v872_v37, %v810_v19  ;;  %v754_v37 = vsub.f32 %v1587_v48, %v1756_v26  ;;  %v817_v39 = vmul.f32 %v753_v35, %v753_v35 }
 0x1ab   :  { %v874_v6 = vadd.f32 %v873_v11, %v811_v28  ;;  %v755_v11 = vsub.f32 %v1602_v57, %v1756_v26  ;;  %v818_v14 = vmul.f32 %v754_v37, %v754_v37 }
 0x1ad   :  { %v875_v51 = vadd.f32 %v874_v6, %v812_v33  ;;  %v756_v6 = vsub.f32 %v1611_v62, %v1756_v26  ;;  %v819_v46 = vmul.f32 %v755_v11, %v755_v11 }
 0x1af   :  { %v876_v13 = vadd.f32 %v875_v51, %v813_v63  ;;  %v757_v51 = vsub.f32 %v1598_v55, %v1756_v26  ;;  %v820_v45 = vmul.f32 %v756_v6, %v756_v6 }
 0x1b1   :  { %v877_v19 = vadd.f32 %v876_v13, %v814_v18  ;;  %v758_v13 = vsub.f32 %v1607_v60, %v1756_v26  ;;  %v821_v35 = vmul.f32 %v757_v51, %v757_v51 }
 0x1b3   :  { %v878_v28 = vadd.f32 %v877_v19, %v815_v25  ;;  %v759_v19 = vsub.f32 %v1622_v5, %v1756_v26  ;;  %v822_v37 = vmul.f32 %v758_v13, %v758_v13 }
 0x1b5   :  { %v879_v33 = vadd.f32 %v878_v28, %v816_v44  ;;  %v760_v28 = vsub.f32 %v1631_v10, %v1756_v26  ;;  %v823_v11 = vmul.f32 %v759_v19, %v759_v19 }
 0x1b7   :  { %v880_v63 = vadd.f32 %v879_v33, %v817_v39  ;;  %v761_v33 = vsub.f32 %v1618_v3, %v1756_v26  ;;  %v824_v6 = vmul.f32 %v760_v28, %v760_v28 }
 0x1b9   :  { %v881_v18 = vadd.f32 %v880_v63, %v818_v14  ;;  %v762_v63 = vsub.f32 %v1627_v8, %v1756_v26  ;;  %v825_v51 = vmul.f32 %v761_v33, %v761_v33 }
 0x1bb   :  { %v882_v25 = vadd.f32 %v881_v18, %v819_v46  ;;  %v763_v18 = vsub.f32 %v1642_v17, %v1756_v26  ;;  %v826_v13 = vmul.f32 %v762_v63, %v762_v63 }
 0x1bd   :  { %v883_v44 = vadd.f32 %v882_v25, %v820_v45  ;;  %v764_v25 = vsub.f32 %v1651_v22, %v1756_v26  ;;  %v827_v19 = vmul.f32 %v763_v18, %v763_v18 }
 0x1bf   :  { %v884_v39 = vadd.f32 %v883_v44, %v821_v35  ;;  %v765_v44 = vsub.f32 %v1638_v15, %v1756_v26  ;;  %v828_v28 = vmul.f32 %v764_v25, %v764_v25 }
 0x1c1   :  { %v885_v14 = vadd.f32 %v884_v39, %v822_v37  ;;  %v766_v39 = vsub.f32 %v1647_v20, %v1756_v26  ;;  %v829_v33 = vmul.f32 %v765_v44, %v765_v44 }
 0x1c3   :  { %v886_v46 = vadd.f32 %v885_v14, %v823_v11  ;;  %v767_v14 = vsub.f32 %v1662_v29, %v1756_v26  ;;  %v830_v63 = vmul.f32 %v766_v39, %v766_v39 }
 0x1c5   :  { %v887_v45 = vadd.f32 %v886_v46, %v824_v6  ;;  %v768_v46 = vsub.f32 %v1671_v34, %v1756_v26  ;;  %v831_v18 = vmul.f32 %v767_v14, %v767_v14 }
 0x1c7   :  { %v888_v35 = vadd.f32 %v887_v45, %v825_v51  ;;  %v769_v45 = vsub.f32 %v1658_v27, %v1756_v26  ;;  %v832_v25 = vmul.f32 %v768_v46, %v768_v46 }
 0x1c9   :  { %v889_v37 = vadd.f32 %v888_v35, %v826_v13  ;;  %v770_v35 = vsub.f32 %v1667_v32, %v1756_v26  ;;  %v833_v44 = vmul.f32 %v769_v45, %v769_v45 }
 0x1cb   :  { %v890_v11 = vadd.f32 %v889_v37, %v827_v19  ;;  %v771_v37 = vsub.f32 %v1682_v54, %v1756_v26  ;;  %v834_v39 = vmul.f32 %v770_v35, %v770_v35 }
 0x1cd   :  { %v891_v6 = vadd.f32 %v890_v11, %v828_v28  ;;  %v2776_v11 = vld [vmem:[#allocation22_spill] sm:$0xff]  ;;  %v835_v14 = vmul.f32 %v771_v37, %v771_v37 }
 0x1ce   :  { %v772_v34 = vsub.f32 %v2776_v11, %v1756_v26 }
 0x1cf   :  { %v892_v51 = vadd.f32 %v891_v6, %v829_v33  ;;  %v2777_v6 = vld [vmem:[#allocation16_spill] sm:$0xff] }
 0x1d0   :  { %v773_v27 = vsub.f32 %v2777_v6, %v1756_v26  ;;  %v836_v46 = vmul.f32 %v772_v34, %v772_v34 }
 0x1d1   :  { %v893_v13 = vadd.f32 %v892_v51, %v830_v63  ;;  %v2778_v51 = vld [vmem:[#allocation20_spill] sm:$0xff] }
 0x1d2   :  { %v774_v32 = vsub.f32 %v2778_v51, %v1756_v26  ;;  %v837_v45 = vmul.f32 %v773_v27, %v773_v27 }
 0x1d3   :  { %v894_v19 = vadd.f32 %v893_v13, %v831_v18  ;;  %v2779_v13 = vld [vmem:[#allocation26_spill] sm:$0xff] }
 0x1d4   :  { %v775_v54 = vsub.f32 %v2779_v13, %v1756_v26  ;;  %v838_v35 = vmul.f32 %v774_v32, %v774_v32 }
 0x1d5   :  { %v895_v28 = vadd.f32 %v894_v19, %v832_v25  ;;  %v776_v19 = vsub.f32 %v1711_v58, %v1756_v26 }
 0x1d6   :  { %v839_v37 = vmul.f32 %v775_v54, %v775_v54 }
 0x1d7   :  { %v896_v33 = vadd.f32 %v895_v28, %v833_v44  ;;  %v777_v28 = vsub.f32 %v1698_v23, %v1756_v26  ;;  %v840_v34 = vmul.f32 %v776_v19, %v776_v19 }
 0x1d9   :  { %v897_v63 = vadd.f32 %v896_v33, %v834_v39  ;;  %v778_v33 = vsub.f32 %v1707_v40, %v1756_v26  ;;  %v841_v27 = vmul.f32 %v777_v28, %v777_v28 }
 0x1db   :  { %v898_v18 = vadd.f32 %v897_v63, %v835_v14  ;;  %v779_v63 = vsub.f32 %v1718_v2, %v1756_v26  ;;  %v842_v32 = vmul.f32 %v778_v33, %v778_v33 }
 0x1dd   :  { %v899_v25 = vadd.f32 %v898_v18, %v836_v46  ;;  %v780_v18 = vsub.f32 %v1723_v52, %v1756_v26  ;;  %v843_v54 = vmul.f32 %v779_v63, %v779_v63  ;;  %v924_v63 = vlaneseq }
 0x1df   :  { %v900_v44 = vadd.f32 %v899_v25, %v837_v45  ;;  %v781_v25 = vsub.f32 %v1716_v42, %v1756_v26  ;;  %v844_v19 = vmul.f32 %v780_v18, %v780_v18  ;;  %v917_v18 = vld [vmem:[%s2683_s2] sm:$0x1] }
 0x1e1   :  { %v901_v39 = vadd.f32 %v900_v44, %v838_v35  ;;  %v782_v44 = vsub.f32 %v1721_v24, %v1756_v26 }
 0x1e3   :  { %v902_v14 = vadd.f32 %v901_v39, %v839_v37  ;;  %v845_v39 = vmul.f32 %v781_v25, %v781_v25  ;;  %v846_v2 = vmul.f32 %v782_v44, %v782_v44 }
 0x1e5   :  { %v903_v46 = vadd.f32 %v902_v14, %v840_v34 }
 0x1e7   :  { %v904_v45 = vadd.f32 %v903_v46, %v841_v27 }
 0x1e9   :  { %v905_v35 = vadd.f32 %v904_v45, %v842_v32  ;;  %v1886_v32 = vshrl.u32 %v924_v63, 7  ;;  %v2786_v63 = vld [vmem:[#allocation13_spill] sm:$0xff] }
 0x1eb   :  { %v906_v37 = vadd.f32 %v905_v35, %v843_v54  ;;  %v2732_v45 = vsub.s32 0, %v1886_v32  ;;  %v2780_v35 = vld [vmem:[#allocation2_spill] sm:$0xff] }
 0x1ed   :  { %v907_v40 = vadd.f32 %v906_v37, %v844_v19  ;;  %v2782_v37 = vld [vmem:[#allocation4_spill] sm:$0xff] }
 0x1ef   :  { %v908_v28 = vadd.f32 %v907_v40, %v845_v39 }
 0x1f1   :  { %v909_v34 = vadd.f32 %v908_v28, %v846_v2 }
 0x1f3   :  { %v910_v14 = vrot.slane %v909_v34, 4 }
 0x1f5   :  { %v911_v23 = vadd.f32 %v910_v14, %v909_v34 }
 0x1f7   :  { %v912_v52 = vrot.slane %v911_v23, 2 }
 0x1f9   :  { %v913_v33 = vadd.f32 %v912_v52, %v911_v23  ;;  %v1895_v52 = vld [vmem:[%s2683_s2 + $0x1] sm:$0x1] }
 0x1fb   :  { %v914_v27 = vrot.slane %v913_v33, 1 }
 0x1fd   :  { %v915_v46 = vadd.f32 %v914_v27, %v913_v33  ;;  %v2783_v33 = vld [vmem:[#allocation6_spill] sm:$0xff]  ;;  %v2784_v27 = vld [vmem:[#allocation7_spill] sm:$0xff] }
 0x1ff   :  { %v916_v58 = vmul.f32 0.001953125, %v915_v46  ;;  %v2785_v46 = vld [vmem:[#allocation10_spill] sm:$0xff] }
 0x201   :  { %v918_v42 = vadd.f32 1e-05, %v916_v58  ;;  %v2793_v58 = vld [vmem:[#allocation25_spill] sm:$0xff] }
 0x203   :  { %1405 = vrsqrt.f32 %v918_v42 }
 0x20d   :  { %v1406_v40 = vpop.eup %1405 }
 0x20e   :  { %v920_v2 = vmul.f32 %v1406_v40, %v917_v18  ;;  %v2787_v18 = vld [vmem:[#allocation8_spill] sm:$0xff]  ;;  %v2788_v40 = vld [vmem:[#allocation11_spill] sm:$0xff] }
 0x210   :  { %v1898_v23 = vmul.f32 %v920_v2, %v1756_v26  ;;  %v1902_v42 = vrot.slane %v920_v2, %v2732_v45  ;;  %v2781_v26 = vld [vmem:[#allocation3_spill] sm:$0xff]  ;;  %v2797_v45 = vld [vmem:[#allocation14_spill] sm:$0xff] }
 0x212   :  { %v1908_v25 = vmul.f32 %v1902_v42, %v1566_v36  ;;  %v1912_v54 = vmul.f32 %v1902_v42, %v1570_v38  ;;  %v1916_v44 = vmul.f32 %v2780_v35, %v1902_v42  ;;  %v1920_v19 = vmul.f32 %v2781_v26, %v1902_v42  ;;  %v2789_v35 = vld [vmem:[#allocation17_spill] sm:$0xff] }
 0x213   :  { %v1924_v39 = vmul.f32 %v1902_v42, %v2782_v37  ;;  %v1928_v36 = vmul.f32 %v1902_v42, %v1589_v49  ;;  %v1932_v38 = vmul.f32 %v1575_v41, %v1902_v42  ;;  %v1936_v28 = vmul.f32 %v1585_v47, %v1902_v42  ;;  %v2790_v37 = vld [vmem:[#allocation21_spill] sm:$0xff] }
 0x214   :  { %v1940_v34 = vmul.f32 %v1902_v42, %v1600_v56  ;;  %v1944_v14 = vmul.f32 %v1902_v42, %v1609_v61  ;;  %v1948_v49 = vmul.f32 %v1595_v53, %v1902_v42  ;;  %v1952_v41 = vmul.f32 %v1605_v59, %v1902_v42 }
 0x215   :  { %v1956_v47 = vmul.f32 %v1902_v42, %v1620_v4  ;;  %v1960_v56 = vmul.f32 %v1902_v42, %v1629_v9  ;;  %v1964_v61 = vmul.f32 %v1615_v1, %v1902_v42  ;;  %v1968_v53 = vmul.f32 %v1625_v7, %v1902_v42 }
 0x216   :  { %v1972_v59 = vmul.f32 %v1902_v42, %v1640_v16  ;;  %v1976_v4 = vmul.f32 %v1902_v42, %v1649_v21  ;;  %v1980_v9 = vmul.f32 %v2783_v33, %v1902_v42  ;;  %v1984_v1 = vmul.f32 %v2784_v27, %v1902_v42  ;;  %v2791_v27 = vld [vmem:[#allocation15_spill] sm:$0xff] }
 0x217   :  { %v1988_v7 = vmul.f32 %v1902_v42, %v2785_v46  ;;  %v1992_v16 = vmul.f32 %v1902_v42, %v2786_v63  ;;  %v1996_v21 = vmul.f32 %v2787_v18, %v1902_v42  ;;  %v2000_v2 = vmul.f32 %v2788_v40, %v1902_v42  ;;  %v2792_v63 = vld [vmem:[#allocation19_spill] sm:$0xff] }
 0x218   :  { %v2004_v26 = vmul.f32 %v1902_v42, %v2789_v35  ;;  %v2008_v33 = vmul.f32 %v1902_v42, %v2790_v37  ;;  %v2012_v46 = vmul.f32 %v2791_v27, %v1902_v42  ;;  %v2016_v18 = vmul.f32 %v2792_v63, %v1902_v42 }
 0x219   :  { %v2020_v40 = vmul.f32 %v1902_v42, %v2793_v58  ;;  %v2024_v35 = vmul.f32 %v1902_v42, %v2772_v31  ;;  %v2028_v37 = vmul.f32 %v2773_v30, %v1902_v42  ;;  %v2032_v27 = vmul.f32 %v2774_v12, %v1902_v42 }
 0x21a   :  { %v2036_v63 = vmul.f32 %v1902_v42, %v2775_v0  ;;  %v2040_v58 = vmul.f32 %v1902_v42, %v1591_v50  ;;  %v2044_v31 = vmul.f32 %v1578_v43, %v1902_v42  ;;  %v2048_v30 = vmul.f32 %v1587_v48, %v1902_v42 }
 0x21b   :  { %v2052_v12 = vmul.f32 %v1902_v42, %v1602_v57  ;;  %v2056_v0 = vmul.f32 %v1902_v42, %v1611_v62  ;;  %v2060_v50 = vmul.f32 %v1598_v55, %v1902_v42  ;;  %v2064_v43 = vmul.f32 %v1607_v60, %v1902_v42 }
 0x21c   :  { %v2068_v48 = vmul.f32 %v1902_v42, %v1622_v5  ;;  %v2072_v57 = vmul.f32 %v1902_v42, %v1631_v10  ;;  %v2076_v62 = vmul.f32 %v1618_v3, %v1902_v42  ;;  %v2080_v55 = vmul.f32 %v1627_v8, %v1902_v42 }
 0x21d   :  { %v2084_v60 = vmul.f32 %v1902_v42, %v1642_v17  ;;  %v2088_v5 = vmul.f32 %v1902_v42, %v1651_v22  ;;  %v2092_v10 = vmul.f32 %v1638_v15, %v1902_v42  ;;  %v2096_v3 = vmul.f32 %v1647_v20, %v1902_v42 }
 0x21e   :  { %v2100_v8 = vmul.f32 %v1902_v42, %v1662_v29  ;;  %v2104_v17 = vmul.f32 %v1902_v42, %v2797_v45  ;;  %v2120_v29 = vmul.f32 %v1902_v42, %v2776_v11  ;;  %v2124_v45 = vmul.f32 %v2777_v6, %v1902_v42 }
 0x21f   :  { %2794 = vst [vmem:[#allocation29_spill] sm:$0xff] %v2084_v60  ;;  %2795 = vst [vmem:[#allocation23_spill] sm:$0xff] %v2088_v5  ;;  %v2798_v60 = vld [vmem:[#allocation9_spill] sm:$0xff]  ;;  %v2799_v5 = vld [vmem:[#allocation12_spill] sm:$0xff] }
 0x220   :  { %2796 = vst [vmem:[#allocation27_spill] sm:$0xff] %v2092_v10  ;;  %v2108_v22 = vmul.f32 %v2798_v60, %v1902_v42  ;;  %v2112_v15 = vmul.f32 %v2799_v5, %v1902_v42  ;;  %v2801_v10 = vld [vmem:[#allocation18_spill] sm:$0xff]  ;;  %2803 = vst [vmem:[#allocation16_spill] sm:$0xff] %v2120_v29  ;;  %v2128_v60 = vmul.f32 %v2778_v51, %v1902_v42  ;;  %v2810_v29 = vld [vmem:[#allocation28_spill] sm:$0xff] }
 0x221   :  { %v2116_v20 = vmul.f32 %v1902_v42, %v2801_v10  ;;  %2804 = vst [vmem:[#allocation20_spill] sm:$0xff] %v2124_v45  ;;  %v2132_v5 = vmul.f32 %v1902_v42, %v2779_v13  ;;  %v2144_v6 = vmul.f32 %v2810_v29, %v1902_v42  ;;  %v2812_v45 = vld [vmem:[#allocation32_spill] sm:$0xff]  ;;  %v2816_v29 = vsub.f32 %v1895_v52, %v1898_v23 }
 0x222   :  { %2800 = vst [vmem:[#allocation5_spill] sm:$0xff] %v2112_v15  ;;  %2805 = vst [vmem:[#allocation26_spill] sm:$0xff] %v2128_v60  ;;  %v2807_v15 = vld [vmem:[#allocation30_spill] sm:$0xff]  ;;  %v2148_v51 = vmul.f32 %v1902_v42, %v2812_v45  ;;  %v2813_v60 = vld [vmem:[#allocation33_spill] sm:$0xff] }
 0x223   :  { %2802 = vst [vmem:[#allocation22_spill] sm:$0xff] %v2116_v20  ;;  %2806 = vst [vmem:[#allocation2_spill] sm:$0xff] %v2132_v5  ;;  %v2136_v10 = vmul.f32 %v1902_v42, %v2807_v15  ;;  %v2808_v20 = vld [vmem:[#allocation24_spill] sm:$0xff]  ;;  %v2152_v13 = vmul.f32 %v1902_v42, %v2813_v60  ;;  %v2814_v5 = vld [vmem:[#allocation31_spill] sm:$0xff] }
 0x224   :  { %v2140_v11 = vmul.f32 %v2808_v20, %v1902_v42  ;;  %2811 = vst [vmem:[#allocation4_spill] sm:$0xff] %v2144_v6  ;;  %v2156_v15 = vmul.f32 %v2814_v5, %v1902_v42  ;;  %v2160_v20 = vmul.f32 %v1721_v24, %v1902_v42 }
 0x226   :  { %2809 = vst [vmem:[#allocation3_spill] sm:$0xff] %v2140_v11  ;;  %v2815_v11 = vsub.s32 0, %v1886_v32 }
 0x228   :  { %v2167_v6 = vrot.slane %v2816_v29, %v2815_v11 }
 0x22a   :  { %v2171_v45 = vadd.f32 %v2167_v6, %v1908_v25  ;;  %v2175_v60 = vadd.f32 %v2167_v6, %v1912_v54  ;;  %v2179_v5 = vadd.f32 %v2167_v6, %v1916_v44  ;;  %v2183_v24 = vadd.f32 %v2167_v6, %v1920_v19 }
 0x22b   :  { %v2187_v32 = vadd.f32 %v2167_v6, %v1924_v39  ;;  %v2191_v52 = vadd.f32 %v2167_v6, %v1928_v36  ;;  %v2195_v23 = vadd.f32 %v2167_v6, %v1932_v38  ;;  %v2199_v42 = vadd.f32 %v2167_v6, %v1936_v28 }
 0x22c   :  { %v2203_v25 = vadd.f32 %v2167_v6, %v1940_v34  ;;  %v2207_v54 = vadd.f32 %v2167_v6, %v1944_v14  ;;  %v2211_v44 = vadd.f32 %v2167_v6, %v1948_v49  ;;  %v2215_v19 = vadd.f32 %v2167_v6, %v1952_v41 }
 0x22d   :  { %v2219_v39 = vadd.f32 %v2167_v6, %v1956_v47  ;;  %v2223_v36 = vadd.f32 %v2167_v6, %v1960_v56  ;;  %v2227_v38 = vadd.f32 %v2167_v6, %v1964_v61  ;;  %v2231_v28 = vadd.f32 %v2167_v6, %v1968_v53 }
 0x22e   :  { %v2235_v34 = vadd.f32 %v2167_v6, %v1972_v59  ;;  %v2239_v14 = vadd.f32 %v2167_v6, %v1976_v4  ;;  %v2243_v49 = vadd.f32 %v2167_v6, %v1980_v9  ;;  %v2247_v41 = vadd.f32 %v2167_v6, %v1984_v1 }
 0x22f   :  { %v2251_v47 = vadd.f32 %v2167_v6, %v1988_v7  ;;  %v2255_v56 = vadd.f32 %v2167_v6, %v1992_v16  ;;  %v2259_v61 = vadd.f32 %v2167_v6, %v1996_v21  ;;  %v2263_v53 = vadd.f32 %v2167_v6, %v2000_v2 }
 0x230   :  { %v2267_v59 = vadd.f32 %v2167_v6, %v2004_v26  ;;  %v2271_v4 = vadd.f32 %v2167_v6, %v2008_v33  ;;  %v2275_v9 = vadd.f32 %v2167_v6, %v2012_v46  ;;  %v2279_v1 = vadd.f32 %v2167_v6, %v2016_v18 }
 0x231   :  { %v2283_v7 = vadd.f32 %v2167_v6, %v2020_v40  ;;  %v2287_v16 = vadd.f32 %v2167_v6, %v2024_v35  ;;  %v2291_v21 = vadd.f32 %v2167_v6, %v2028_v37  ;;  %v2295_v2 = vadd.f32 %v2167_v6, %v2032_v27 }
 0x232   :  { %v2299_v26 = vadd.f32 %v2167_v6, %v2036_v63  ;;  %v2303_v33 = vadd.f32 %v2167_v6, %v2040_v58  ;;  %v2307_v46 = vadd.f32 %v2167_v6, %v2044_v31  ;;  %v2311_v18 = vadd.f32 %v2167_v6, %v2048_v30 }
 0x233   :  { %v2315_v40 = vadd.f32 %v2167_v6, %v2052_v12  ;;  %v2319_v35 = vadd.f32 %v2167_v6, %v2056_v0  ;;  %v2323_v37 = vadd.f32 %v2167_v6, %v2060_v50  ;;  %v2327_v27 = vadd.f32 %v2167_v6, %v2064_v43  ;;  %v2817_v12 = vld [vmem:[#allocation29_spill] sm:$0xff]  ;;  %v2818_v50 = vld [vmem:[#allocation23_spill] sm:$0xff] }
 0x234   :  { %v2331_v63 = vadd.f32 %v2167_v6, %v2068_v48  ;;  %v2335_v58 = vadd.f32 %v2167_v6, %v2072_v57  ;;  %v2339_v31 = vadd.f32 %v2167_v6, %v2076_v62  ;;  %v2343_v30 = vadd.f32 %v2167_v6, %v2080_v55  ;;  %v2819_v48 = vld [vmem:[#allocation27_spill] sm:$0xff] }
 0x235   :  { %v2347_v0 = vadd.f32 %v2167_v6, %v2817_v12  ;;  %v2351_v43 = vadd.f32 %v2167_v6, %v2818_v50  ;;  %v2355_v57 = vadd.f32 %v2167_v6, %v2819_v48  ;;  %v2359_v62 = vadd.f32 %v2167_v6, %v2096_v3  ;;  %v2824_v12 = vld [vmem:[#allocation5_spill] sm:$0xff]  ;;  %v2825_v48 = vld [vmem:[#allocation22_spill] sm:$0xff] }
 0x236   :  { %v2363_v55 = vadd.f32 %v2167_v6, %v2100_v8  ;;  %v2367_v11 = vadd.f32 %v2167_v6, %v2104_v17  ;;  %v2371_v29 = vadd.f32 %v2167_v6, %v2108_v22  ;;  %v2375_v50 = vadd.f32 %v2167_v6, %v2824_v12 }
 0x237   :  { %2820 = vst [vmem:[#allocation6_spill] sm:$0xff] %v2359_v62  ;;  %v2379_v3 = vadd.f32 %v2167_v6, %v2825_v48  ;;  %v2827_v62 = vld [vmem:[#allocation16_spill] sm:$0xff]  ;;  %v2399_v48 = vadd.f32 %v2167_v6, %v2136_v10  ;;  %v2419_v10 = vadd.f32 %v2167_v6, %v2156_v15  ;;  %v1067_v15 = vmax.f32 %v2199_v42, 0.0 }
 0x238   :  { %2821 = vst [vmem:[#allocation7_spill] sm:$0xff] %v2363_v55  ;;  %2822 = vst [vmem:[#allocation10_spill] sm:$0xff] %v2367_v11  ;;  %v2383_v8 = vadd.f32 %v2167_v6, %v2827_v62  ;;  %v2829_v55 = vld [vmem:[#allocation20_spill] sm:$0xff]  ;;  %v2830_v11 = vld [vmem:[#allocation26_spill] sm:$0xff]  ;;  %v1078_v42 = vmax.f32 %v2243_v49, 0.0  ;;  %v1089_v49 = vmax.f32 %v2287_v16, 0.0 }
 0x239   :  { %2823 = vst [vmem:[#allocation13_spill] sm:$0xff] %v2371_v29  ;;  %2826 = vst [vmem:[#allocation8_spill] sm:$0xff] %v2379_v3  ;;  %v2387_v17 = vadd.f32 %v2167_v6, %v2829_v55  ;;  %v2391_v22 = vadd.f32 %v2167_v6, %v2830_v11  ;;  %v2831_v29 = vld [vmem:[#allocation2_spill] sm:$0xff]  ;;  %v2832_v3 = vld [vmem:[#allocation3_spill] sm:$0xff]  ;;  %v2411_v11 = vadd.f32 %v2167_v6, %v2148_v51  ;;  %v1063_v51 = vmax.f32 %v2183_v24, 0.0 }
 0x23a   :  { %2828 = vst [vmem:[#allocation11_spill] sm:$0xff] %v2383_v8  ;;  %v2395_v12 = vadd.f32 %v2167_v6, %v2831_v29  ;;  %v2403_v62 = vadd.f32 %v2167_v6, %v2832_v3  ;;  %v2834_v8 = vld [vmem:[#allocation4_spill] sm:$0xff]  ;;  %v2415_v29 = vadd.f32 %v2167_v6, %v2152_v13  ;;  %2838 = vst [vmem:[#allocation25_spill] sm:$0xff] %v2419_v10  ;;  %v1065_v13 = vmax.f32 %v2191_v52, 0.0 }
 0x23b   :  { %v2407_v55 = vadd.f32 %v2167_v6, %v2834_v8  ;;  %2836 = vst [vmem:[#allocation15_spill] sm:$0xff] %v2411_v11  ;;  %v2423_v3 = vadd.f32 %v2167_v6, %v2160_v20  ;;  %v1061_v8 = vmax.f32 %v2175_v60, 0.0  ;;  %v1064_v11 = vmax.f32 %v2187_v32, 0.0  ;;  %1127 = vst [vmem:[%s2684_s3 + $0x18] sm:$0xff] %v1063_v51 }
 0x23c   :  { %2833 = vst [vmem:[#allocation17_spill] sm:$0xff] %v2403_v62  ;;  %2837 = vst [vmem:[#allocation19_spill] sm:$0xff] %v2415_v29  ;;  %v1060_v62 = vmax.f32 %v2171_v45, 0.0  ;;  %v1066_v29 = vmax.f32 %v2195_v23, 0.0  ;;  %v1068_v10 = vmax.f32 %v2203_v25, 0.0  ;;  %v1069_v6 = vmax.f32 %v2207_v54, 0.0 }
 0x23d   :  { %2835 = vst [vmem:[#allocation21_spill] sm:$0xff] %v2407_v55  ;;  %v1062_v55 = vmax.f32 %v2179_v5, 0.0  ;;  %v1070_v20 = vmax.f32 %v2211_v44, 0.0  ;;  %v1071_v45 = vmax.f32 %v2215_v19, 0.0  ;;  %1125 = vst [vmem:[%s2684_s3 + $0x8] sm:$0xff] %v1061_v8  ;;  %v1072_v60 = vmax.f32 %v2219_v39, 0.0 }
 0x23e   :  { %1124 = vst [vmem:[%s2684_s3] sm:$0xff] %v1060_v62  ;;  %v1073_v5 = vmax.f32 %v2223_v36, 0.0  ;;  %v1074_v24 = vmax.f32 %v2227_v38, 0.0  ;;  %v1075_v32 = vmax.f32 %v2231_v28, 0.0  ;;  %1128 = vst [vmem:[%s2684_s3 + $0x20] sm:$0xff] %v1064_v11  ;;  %v1076_v52 = vmax.f32 %v2235_v34, 0.0 }
 0x23f   :  { %1126 = vst [vmem:[%s2684_s3 + $0x10] sm:$0xff] %v1062_v55  ;;  %1129 = vst [vmem:[%s2684_s3 + $0x28] sm:$0xff] %v1065_v13  ;;  %v1077_v23 = vmax.f32 %v2239_v14, 0.0  ;;  %v1079_v25 = vmax.f32 %v2247_v41, 0.0  ;;  %v1080_v54 = vmax.f32 %v2251_v47, 0.0  ;;  %v1081_v44 = vmax.f32 %v2255_v56, 0.0 }
 0x240   :  { %1130 = vst [vmem:[%s2684_s3 + $0x30] sm:$0xff] %v1066_v29  ;;  %1131 = vst [vmem:[%s2684_s3 + $0x38] sm:$0xff] %v1067_v15  ;;  %v1082_v19 = vmax.f32 %v2259_v61, 0.0  ;;  %v1083_v39 = vmax.f32 %v2263_v53, 0.0  ;;  %v1084_v36 = vmax.f32 %v2267_v59, 0.0  ;;  %v1085_v38 = vmax.f32 %v2271_v4, 0.0 }
 0x241   :  { %1132 = vst [vmem:[%s2684_s3 + $0x40] sm:$0xff] %v1068_v10  ;;  %1133 = vst [vmem:[%s2684_s3 + $0x48] sm:$0xff] %v1069_v6  ;;  %v1086_v28 = vmax.f32 %v2275_v9, 0.0  ;;  %v1087_v34 = vmax.f32 %v2279_v1, 0.0  ;;  %v1088_v14 = vmax.f32 %v2283_v7, 0.0  ;;  %v1090_v41 = vmax.f32 %v2291_v21, 0.0 }
 0x242   :  { %1134 = vst [vmem:[%s2684_s3 + $0x50] sm:$0xff] %v1070_v20  ;;  %1135 = vst [vmem:[%s2684_s3 + $0x58] sm:$0xff] %v1071_v45  ;;  %v1091_v47 = vmax.f32 %v2295_v2, 0.0  ;;  %v1092_v56 = vmax.f32 %v2299_v26, 0.0  ;;  %v1093_v61 = vmax.f32 %v2303_v33, 0.0  ;;  %v1094_v53 = vmax.f32 %v2307_v46, 0.0 }
 0x243   :  { %1136 = vst [vmem:[%s2684_s3 + $0x60] sm:$0xff] %v1072_v60  ;;  %1137 = vst [vmem:[%s2684_s3 + $0x68] sm:$0xff] %v1073_v5  ;;  %v1095_v59 = vmax.f32 %v2311_v18, 0.0  ;;  %v1096_v4 = vmax.f32 %v2315_v40, 0.0  ;;  %v1097_v9 = vmax.f32 %v2319_v35, 0.0  ;;  %v1098_v1 = vmax.f32 %v2323_v37, 0.0 }
 0x244   :  { %1138 = vst [vmem:[%s2684_s3 + $0x70] sm:$0xff] %v1074_v24  ;;  %1139 = vst [vmem:[%s2684_s3 + $0x78] sm:$0xff] %v1075_v32  ;;  %v1099_v7 = vmax.f32 %v2327_v27, 0.0  ;;  %v1100_v16 = vmax.f32 %v2331_v63, 0.0  ;;  %v1101_v21 = vmax.f32 %v2335_v58, 0.0  ;;  %v1102_v2 = vmax.f32 %v2339_v31, 0.0 }
 0x245   :  { %1140 = vst [vmem:[%s2684_s3 + $0x80] sm:$0xff] %v1076_v52  ;;  %1141 = vst [vmem:[%s2684_s3 + $0x88] sm:$0xff] %v1077_v23  ;;  %v1103_v26 = vmax.f32 %v2343_v30, 0.0  ;;  %v1104_v33 = vmax.f32 %v2347_v0, 0.0  ;;  %v1105_v46 = vmax.f32 %v2351_v43, 0.0  ;;  %v1106_v18 = vmax.f32 %v2355_v57, 0.0 }
 0x246   :  { %1142 = vst [vmem:[%s2684_s3 + $0x90] sm:$0xff] %v1078_v42  ;;  %1143 = vst [vmem:[%s2684_s3 + $0x98] sm:$0xff] %v1079_v25  ;;  %v2839_v40 = vld [vmem:[#allocation6_spill] sm:$0xff]  ;;  %v2840_v37 = vld [vmem:[#allocation7_spill] sm:$0xff]  ;;  %v1111_v0 = vmax.f32 %v2375_v50, 0.0  ;;  %v1114_v55 = vmax.f32 %v2387_v17, 0.0 }
 0x247   :  { %1144 = vst [vmem:[%s2684_s3 + $0xa0] sm:$0xff] %v1080_v54  ;;  %1145 = vst [vmem:[%s2684_s3 + $0xa8] sm:$0xff] %v1081_v44  ;;  %v1107_v35 = vmax.f32 %v2839_v40, 0.0  ;;  %v1108_v27 = vmax.f32 %v2840_v37, 0.0  ;;  %v2841_v63 = vld [vmem:[#allocation10_spill] sm:$0xff]  ;;  %v2842_v31 = vld [vmem:[#allocation13_spill] sm:$0xff] }
 0x248   :  { %1146 = vst [vmem:[%s2684_s3 + $0xb0] sm:$0xff] %v1082_v19  ;;  %1147 = vst [vmem:[%s2684_s3 + $0xb8] sm:$0xff] %v1083_v39  ;;  %v1109_v58 = vmax.f32 %v2841_v63, 0.0  ;;  %v1110_v30 = vmax.f32 %v2842_v31, 0.0  ;;  %v2843_v43 = vld [vmem:[#allocation8_spill] sm:$0xff]  ;;  %v2844_v62 = vld [vmem:[#allocation11_spill] sm:$0xff] }
 0x249   :  { %1148 = vst [vmem:[%s2684_s3 + $0xc0] sm:$0xff] %v1084_v36  ;;  %1149 = vst [vmem:[%s2684_s3 + $0xc8] sm:$0xff] %v1085_v38  ;;  %v1112_v57 = vmax.f32 %v2843_v43, 0.0  ;;  %v1113_v50 = vmax.f32 %v2844_v62, 0.0  ;;  %v1115_v11 = vmax.f32 %v2391_v22, 0.0  ;;  %v1116_v17 = vmax.f32 %v2395_v12, 0.0 }
 0x24a   :  { %1150 = vst [vmem:[%s2684_s3 + $0xd0] sm:$0xff] %v1086_v28  ;;  %1151 = vst [vmem:[%s2684_s3 + $0xd8] sm:$0xff] %v1087_v34  ;;  %v1117_v22 = vmax.f32 %v2399_v48, 0.0  ;;  %v2845_v29 = vld [vmem:[#allocation17_spill] sm:$0xff]  ;;  %v2847_v12 = vld [vmem:[#allocation15_spill] sm:$0xff]  ;;  %v1123_v45 = vmax.f32 %v2423_v3, 0.0 }
 0x24b   :  { %1152 = vst [vmem:[%s2684_s3 + $0xe0] sm:$0xff] %v1088_v14  ;;  %1153 = vst [vmem:[%s2684_s3 + $0xe8] sm:$0xff] %v1089_v49  ;;  %v1118_v10 = vmax.f32 %v2845_v29, 0.0  ;;  %v2846_v8 = vld [vmem:[#allocation21_spill] sm:$0xff]  ;;  %v1120_v48 = vmax.f32 %v2847_v12, 0.0  ;;  %v2848_v13 = vld [vmem:[#allocation19_spill] sm:$0xff] }
 0x24c   :  { %1154 = vst [vmem:[%s2684_s3 + $0xf0] sm:$0xff] %v1090_v41  ;;  %1155 = vst [vmem:[%s2684_s3 + $0xf8] sm:$0xff] %v1091_v47  ;;  %v1119_v51 = vmax.f32 %v2846_v8, 0.0  ;;  %v1121_v15 = vmax.f32 %v2848_v13, 0.0  ;;  %v2849_v6 = vld [vmem:[#allocation25_spill] sm:$0xff] }
 0x24d   :  { %1156 = vst [vmem:[%s2684_s3 + $0x100] sm:$0xff] %v1092_v56  ;;  %1157 = vst [vmem:[%s2684_s3 + $0x108] sm:$0xff] %v1093_v61  ;;  %v1122_v20 = vmax.f32 %v2849_v6, 0.0 }
 0x24e   :  { %1158 = vst [vmem:[%s2684_s3 + $0x110] sm:$0xff] %v1094_v53  ;;  %1159 = vst [vmem:[%s2684_s3 + $0x118] sm:$0xff] %v1095_v59 }
 0x24f   :  { %1160 = vst [vmem:[%s2684_s3 + $0x120] sm:$0xff] %v1096_v4  ;;  %1161 = vst [vmem:[%s2684_s3 + $0x128] sm:$0xff] %v1097_v9 }
 0x250   :  { %1162 = vst [vmem:[%s2684_s3 + $0x130] sm:$0xff] %v1098_v1  ;;  %1163 = vst [vmem:[%s2684_s3 + $0x138] sm:$0xff] %v1099_v7 }
 0x251   :  { %1164 = vst [vmem:[%s2684_s3 + $0x140] sm:$0xff] %v1100_v16  ;;  %1165 = vst [vmem:[%s2684_s3 + $0x148] sm:$0xff] %v1101_v21 }
 0x252   :  { %1166 = vst [vmem:[%s2684_s3 + $0x150] sm:$0xff] %v1102_v2  ;;  %1167 = vst [vmem:[%s2684_s3 + $0x158] sm:$0xff] %v1103_v26 }
 0x253   :  { %1168 = vst [vmem:[%s2684_s3 + $0x160] sm:$0xff] %v1104_v33  ;;  %1169 = vst [vmem:[%s2684_s3 + $0x168] sm:$0xff] %v1105_v46 }
 0x254   :  { %1170 = vst [vmem:[%s2684_s3 + $0x170] sm:$0xff] %v1106_v18  ;;  %1171 = vst [vmem:[%s2684_s3 + $0x178] sm:$0xff] %v1107_v35 }
 0x255   :  { %1172 = vst [vmem:[%s2684_s3 + $0x180] sm:$0xff] %v1108_v27  ;;  %1173 = vst [vmem:[%s2684_s3 + $0x188] sm:$0xff] %v1109_v58 }
 0x256   :  { %1174 = vst [vmem:[%s2684_s3 + $0x190] sm:$0xff] %v1110_v30  ;;  %1175 = vst [vmem:[%s2684_s3 + $0x198] sm:$0xff] %v1111_v0 }
 0x257   :  { %1176 = vst [vmem:[%s2684_s3 + $0x1a0] sm:$0xff] %v1112_v57  ;;  %1177 = vst [vmem:[%s2684_s3 + $0x1a8] sm:$0xff] %v1113_v50 }
 0x258   :  { %1178 = vst [vmem:[%s2684_s3 + $0x1b0] sm:$0xff] %v1114_v55  ;;  %1179 = vst [vmem:[%s2684_s3 + $0x1b8] sm:$0xff] %v1115_v11 }
 0x259   :  { %1180 = vst [vmem:[%s2684_s3 + $0x1c0] sm:$0xff] %v1116_v17  ;;  %1181 = vst [vmem:[%s2684_s3 + $0x1c8] sm:$0xff] %v1117_v22 }
 0x25a   :  { %1182 = vst [vmem:[%s2684_s3 + $0x1d0] sm:$0xff] %v1118_v10  ;;  %1183 = vst [vmem:[%s2684_s3 + $0x1d8] sm:$0xff] %v1119_v51 }
 0x25b   :  { %1184 = vst [vmem:[%s2684_s3 + $0x1e0] sm:$0xff] %v1120_v48  ;;  %1185 = vst [vmem:[%s2684_s3 + $0x1e8] sm:$0xff] %v1121_v15 }
 0x25c   :  { %1186 = vst [vmem:[%s2684_s3 + $0x1f0] sm:$0xff] %v1122_v20  ;;  %1187 = vst [vmem:[%s2684_s3 + $0x1f8] sm:$0xff] %v1123_v45 }

</bundles_post_ra>
